<compile_context>
chip_gen: v7x
topology: tpu7x:2x2x1
jax: 0.10.0
libtpu: 0.0.40
codegen_flags: <defaults>
</compile_context>

<pallas_src>
import math

import jax
import jax.numpy as jnp
from jax.experimental import pallas as pl
from jax.experimental.pallas import tpu as pltpu


def _round_up(x, m):
    return ((x + m - 1) // m) * m


def _largest_aligned_divisor(dim, cap):
    """Largest multiple of 128 that divides `dim` (a multiple of 128), <= cap."""
    m = dim // 128
    best = 1
    for d in range(1, m + 1):
        if m % d == 0 and d * 128 <= cap:
            best = d
    return best * 128


def _row_tile(n_p):
    """Output-row tile: <= 256, and >= 2 tiles whenever n_p allows (megacore)."""
    m = n_p // 128
    if m >= 4 and m % 2 == 0:
        return 256
    return 128


def _vmem_limit_bytes():
    """~80% of physical VMEM per core (generation-aware); None -> compiler default."""
    try:
        info = pltpu.get_tpu_info()
        cap = getattr(info, "vmem_capacity_bytes", None)
        if cap:
            return int(cap * 0.8)
    except Exception:
        pass
    return None


# --------------------- kernel 1: support = x @ W ---------------------------
def _project_kernel(x_ref, w_ref, sup_ref):
    sup_ref[...] = jnp.dot(
        x_ref[...], w_ref[...], preferred_element_type=jnp.float32
    ).astype(sup_ref.dtype)


# ------------------ kernel 2: out = adj @ support + bias -------------------
def _aggregate_stream_kernel(adj_ref, sup_ref, b_ref, out_ref):
    # support chunk streamed per k step; out_ref (f32, constant block index
    # over k -> VMEM resident) is the accumulator, seeded with the bias.
    @pl.when(pl.program_id(1) == 0)
    def _():
        out_ref[...] = jnp.broadcast_to(b_ref[...], out_ref.shape)

    out_ref[...] += jnp.dot(
        adj_ref[...], sup_ref[...], preferred_element_type=jnp.float32
    )


def _aggregate_resident_kernel(adj_ref, sup_ref, b_ref, out_ref):
    # full support matrix is VMEM resident (constant block index -> DMA'd
    # once); slice the k-chunk locally instead of re-streaming it from HBM.
    k = pl.program_id(1)

    @pl.when(k == 0)
    def _():
        out_ref[...] = jnp.broadcast_to(b_ref[...], out_ref.shape)

    t_k = adj_ref.shape[1]
    start = pl.multiple_of(k * t_k, t_k)
    out_ref[...] += jnp.dot(
        adj_ref[...], sup_ref[pl.ds(start, t_k), :],
        preferred_element_type=jnp.float32,
    )


def graph_conv(x, adj, weight, bias=None):
    """output = adj @ (x @ weight) + bias via two Pallas TPU kernels.

    adj is consumed in the dtype it is passed in (store it in bf16 upstream
    to halve HBM traffic on the N^2 read; accumulation is always f32).
    """
    n, f_in = x.shape
    f_out = weight.shape[1]
    assert adj.shape == (n, n)

    # Pad only to the 128 lane/sublane granule (not to the larger compute
    # tile) to avoid quadratic blow-up of the N^2 adjacency traffic.
    n_p = _round_up(n, 128)
    f_out_p = _round_up(f_out, 128)

    x_p = x if n_p == n else jnp.pad(x, ((0, n_p - n), (0, 0)))
    w_p = weight if f_out_p == f_out else jnp.pad(weight, ((0, 0), (0, f_out_p - f_out)))
    if bias is None:
        b_p = jnp.zeros((1, f_out_p), jnp.float32)
    else:
        b_p = jnp.pad(bias.astype(jnp.float32), (0, f_out_p - f_out)).reshape(1, f_out_p)

    # No dtype cast of adj here (would be an extra N^2 HBM pass); padding only
    # touches adj for ragged N, and only up to the next multiple of 128.
    # TODO(synk): handle the ragged edge with an in-kernel partial block to
    # drop even this one-time pad pass.
    adj_p = adj if n_p == n else jnp.pad(adj, ((0, n_p - n), (0, n_p - n)))

    # Emit support in adj's (narrow floating) dtype so the aggregation MXU
    # sees a single dtype; f32 otherwise.
    if jnp.issubdtype(adj.dtype, jnp.floating) and jnp.dtype(adj.dtype).itemsize < 4:
        support_dtype = adj.dtype
    else:
        support_dtype = jnp.float32
    sup_itemsize = jnp.dtype(support_dtype).itemsize

    vmem_limit = _vmem_limit_bytes()

    # ---- tiling ----
    t_i = _row_tile(n_p)                          # output-row tile
    t_j = _largest_aligned_divisor(f_out_p, 512)  # projection F_out tile
    n_row_tiles = n_p // t_i
    n_j_tiles = f_out_p // t_j

    # ---- 1) projection: support = x @ W (fully parallel grid) ----
    support = pl.pallas_call(
        _project_kernel,
        out_shape=jax.ShapeDtypeStruct((n_p, f_out_p), support_dtype),
        grid_spec=pltpu.PrefetchScalarGridSpec(
            num_scalar_prefetch=0,
            grid=(n_row_tiles, n_j_tiles),
            in_specs=[
                pl.BlockSpec((t_i, f_in), lambda i, j: (i, 0)),
                pl.BlockSpec((f_in, t_j), lambda i, j: (0, j)),
            ],
            out_specs=pl.BlockSpec((t_i, t_j), lambda i, j: (i, j)),
        ),
        compiler_params=pltpu.CompilerParams(
            dimension_semantics=("parallel", "parallel"),
            vmem_limit_bytes=vmem_limit,
        ),
    )(x_p, w_p)

    # ---- 2) aggregation: out = adj @ support + bias ----
    sup_bytes = n_p * f_out_p * sup_itemsize
    resident = sup_bytes <= 8 * 1024 * 1024  # keep support VMEM-resident if small

    # Wide reduction tile -> long contiguous adj DMA rows, fewer grid steps.
    t_k = _largest_aligned_divisor(n_p, 1024)
    if not resident:
        # bound the streamed support chunk (t_k, f_out_p) to ~4 MiB
        while t_k > 128 and t_k * f_out_p * sup_itemsize > 4 * 1024 * 1024:
            t_k = _largest_aligned_divisor(n_p, t_k - 128)
    n_k_tiles = n_p // t_k

    if resident:
        agg_kernel = _aggregate_resident_kernel
        sup_spec = pl.BlockSpec((n_p, f_out_p), lambda i, k: (0, 0))
    else:
        agg_kernel = _aggregate_stream_kernel
        sup_spec = pl.BlockSpec((t_k, f_out_p), lambda i, k: (k, 0))

    out = pl.pallas_call(
        agg_kernel,
        out_shape=jax.ShapeDtypeStruct((n_p, f_out_p), jnp.float32),
        grid_spec=pltpu.PrefetchScalarGridSpec(
            num_scalar_prefetch=0,
            grid=(n_row_tiles, n_k_tiles),
            in_specs=[
                pl.BlockSpec((t_i, t_k), lambda i, k: (i, k)),    # adj tile
                sup_spec,                                          # support
                pl.BlockSpec((1, f_out_p), lambda i, k: (0, 0)),   # bias row
            ],
            out_specs=pl.BlockSpec((t_i, f_out_p), lambda i, k: (i, 0)),
        ),
        compiler_params=pltpu.CompilerParams(
            dimension_semantics=("parallel", "arbitrary"),
            vmem_limit_bytes=vmem_limit,
        ),
    )(adj_p, support, b_p)

    return out[:n, :f_out]


def graph_conv_reference(x, adj, weight, bias=None):
    out = adj.astype(jnp.float32) @ (x @ weight)
    if bias is not None:
        out = out + bias[None, :]
    return out


def _make_inputs(key, n, f_in, f_out):
    k_x, k_a, k_w, k_b = jax.random.split(key, 4)
    x = jax.random.normal(k_x, (n, f_in), dtype=jnp.float32)
    # Dense row-normalized adjacency with self loops (torch.spmm on a dense
    # adjacency is an ordinary matmul).
    adj_raw = (jax.random.uniform(k_a, (n, n)) < 0.1).astype(jnp.float32)
    adj_raw = adj_raw + jnp.eye(n, dtype=jnp.float32)
    adj = adj_raw / jnp.sum(adj_raw, axis=1, keepdims=True)
    # reset_parameters(): uniform(-stdv, stdv), stdv = 1/sqrt(output_features).
    stdv = 1.0 / math.sqrt(f_out)
    weight = jax.random.uniform(k_w, (f_in, f_out), jnp.float32, -stdv, stdv)
    bias = jax.random.uniform(k_b, (f_out,), jnp.float32, -stdv, stdv)
    return x, adj, weight, bias


if __name__ == "__main__":
    key = jax.random.PRNGKey(0)
    k1, k2 = jax.random.split(key)

    # Case 1: aligned small shapes, f32 adjacency (tight tolerance).
    N, F_IN, F_OUT = 128, 64, 128
    x, adj, weight, bias = _make_inputs(k1, N, F_IN, F_OUT)
    out = jax.block_until_ready(graph_conv(x, adj, weight, bias))
    ref = graph_conv_reference(x, adj, weight, bias)
    assert out.shape == (N, F_OUT)
    assert jnp.allclose(out, ref, atol=1e-4, rtol=1e-4), "f32 mismatch vs reference"

    # Case 2: ragged shapes exercising the 128-granule padding path.
    N2, F_IN2, F_OUT2 = 200, 48, 80
    x2, adj2, weight2, bias2 = _make_inputs(k2, N2, F_IN2, F_OUT2)
    out2 = jax.block_until_ready(graph_conv(x2, adj2, weight2, bias2))
    ref2 = graph_conv_reference(x2, adj2, weight2, bias2)
    assert out2.shape == (N2, F_OUT2)
    assert jnp.allclose(out2, ref2, atol=1e-4, rtol=1e-4), "padded mismatch vs reference"

    # Case 3: adjacency stored upstream in bf16 (halved HBM traffic on the
    # dominant N^2 read; f32 accumulation), looser tolerance.
    out_bf16 = jax.block_until_ready(
        graph_conv(x, adj.astype(jnp.bfloat16), weight, bias)
    )
    assert jnp.allclose(out_bf16, ref, atol=5e-2, rtol=5e-2), "bf16 mismatch vs reference"

    print("KERNEL_OK")
</pallas_src>

<mosaic_0001>
module attributes {stable_mosaic.version = 11 : i64} {
  func.func @_project_kernel(%arg0: i32, %arg1: i32, %arg2: memref<128x64xf32, #tpu.memory_space<vmem>>, %arg3: memref<64x128xf32, #tpu.memory_space<vmem>>, %arg4: memref<128x128xf32, #tpu.memory_space<vmem>>) attributes {dimension_semantics = [#tpu.dimension_semantics<parallel>, #tpu.dimension_semantics<parallel>], iteration_bounds = array<i64: 1, 1>, scalar_prefetch = 0 : i64, scratch_operands = 0 : i64, tpu.core_type = #tpu.core_type<tc>, window_params = [{transform_indices = @transform_0, window_bounds = array<i64: 128, 64>}, {transform_indices = @transform_1, window_bounds = array<i64: 64, 128>}, {transform_indices = @transform_2, window_bounds = array<i64: 128, 128>}]} {
    %c0 = arith.constant 0 : index
    %c0_0 = arith.constant 0 : index
    %0 = vector.load %arg2[%c0, %c0_0] : memref<128x64xf32, #tpu.memory_space<vmem>>, vector<128x64xf32>
    %c0_1 = arith.constant 0 : index
    %c0_2 = arith.constant 0 : index
    %1 = vector.load %arg3[%c0_1, %c0_2] : memref<64x128xf32, #tpu.memory_space<vmem>>, vector<64x128xf32>
    %cst = arith.constant dense<0.000000e+00> : vector<128x128xf32>
    %2 = tpu.matmul %0, %1, %cst {dimension_numbers = #tpu.dot_dimension_numbers<[1], [0], [0], [1], [0, 0, 1, 1], [], []>} : vector<128x64xf32>, vector<64x128xf32>, vector<128x128xf32> -> vector<128x128xf32>
    %c0_3 = arith.constant 0 : index
    %c0_4 = arith.constant 0 : index
    %3 = vector.load %arg4[%c0_3, %c0_4] : memref<128x128xf32, #tpu.memory_space<vmem>>, vector<128x128xf32>
    tpu.vector_store %arg4[%c0_3, %c0_4], %2 {strides = array<i32>} : memref<128x128xf32, #tpu.memory_space<vmem>>, vector<128x128xf32>,
    return
  }
  func.func @transform_0(%arg0: i32, %arg1: i32) -> (i32, i32) {
    %c0_i32 = arith.constant 0 : i32
    %c0_i32_0 = arith.constant 0 : i32
    return %arg0, %c0_i32 : i32, i32
  }
  func.func @transform_1(%arg0: i32, %arg1: i32) -> (i32, i32) {
    %c0_i32 = arith.constant 0 : i32
    %c0_i32_0 = arith.constant 0 : i32
    return %c0_i32, %arg1 : i32, i32
  }
  func.func @transform_2(%arg0: i32, %arg1: i32) -> (i32, i32) {
    %c0_i32 = arith.constant 0 : i32
    return %arg0, %arg1 : i32, i32
  }
}

</mosaic_0001>

<bundles_post_ra>
// kernel: tpu_custom_call.1
= control target key start
LH: loop header
LB: loop body
LE: loop exit
PB: predicated region body
PF: predicated region fallthrough
CT: control target
= control target key end

     0   :  { %vm36_vm0 = vcmask 523264   ;;  %s511_s0 = inlined_call_operand.vmem [shape: f32[128,64], index: 0, kind: input, shape index: {}]   ;;  %s512_s1 = inlined_call_operand.vmem [shape: f32[64,128], index: 1, kind: input, shape index: {}]   ;;  %s513_s2 = inlined_call_operand.hbm [shape: f32[128,128], index: 2, kind: output, shape index: {}]  }
   0x1   :  { %v28_v0 = vld [vmem:[%s512_s1] sm:$0xff]  ;;  %v29_v1 = vld [vmem:[%s512_s1 + $0x8] sm:$0xff]  ;;  %v30_v2 = vld [vmem:[%s512_s1 + $0x10] sm:$0xff] }
   0x2   :  { %v342_v3 = vpack.c.bf16 %v29_v1, %v28_v0  ;;  %v31_v4 = vld [vmem:[%s512_s1 + $0x18] sm:$0xff]  ;;  %v32_v6 = vld [vmem:[%s512_s1 + $0x20] sm:$0xff]  ;;  %v33_v7 = vld [vmem:[%s512_s1 + $0x28] sm:$0xff] }
   0x3   :  { %v346_v5 = vpack.c.bf16 %v31_v4, %v30_v2  ;;  %v12_v8 = vld [vmem:[%s511_s0] sm:$0xff]  ;;  %v350_v10 = vpack.c.bf16 %v33_v7, %v32_v6  ;;  %v34_v11 = vld [vmem:[%s512_s1 + $0x30] sm:$0xff]  ;;  %v35_v12 = vld [vmem:[%s512_s1 + $0x38] sm:$0xff] }
   0x4   :  { %343 = vmatprep.subr.bf16.mxu0 %v342_v3  ;;  %358 = vmatprep.subr.bf16.mxu1 %v342_v3  ;;  %v20_v9 = vld [vmem:[%s511_s0 + $0x40] sm:$0xff] }
   0x5   :  { %345 = vmatpush3.bf16.msra.mxu0 %v342_v3  ;;  %362 = vmatpush3.bf16.msra.mxu1 %v342_v3 }
   0x6   :  { %347 = vmatprep.subr.bf16.mxu0 %v346_v5  ;;  %359 = vmatprep.subr.bf16.mxu1 %v346_v5 }
   0x7   :  { %318 = vmatprep.mubr.msk.f32.mxu0 %vm36_vm0, %v12_v8  ;;  %330 = vmatprep.mubr.msk.f32.mxu1 %vm36_vm0, %v20_v9 }
   0x9   :  { %349 = vmatpush3.bf16.msra.mxu0 %v346_v5  ;;  %363 = vmatpush3.bf16.msra.mxu1 %v346_v5 }
   0xa   :  { %7 = vsyncpa [#allocation3], 0  ;;  %351 = vmatprep.subr.bf16.mxu0 %v350_v10  ;;  %360 = vmatprep.subr.bf16.mxu1 %v350_v10  ;;  %v354_v13 = vpack.c.bf16 %v35_v12, %v34_v11  ;;  %v13_v14 = vld [vmem:[%s511_s0 + $0x8] sm:$0xff]  ;;  %v14_v16 = vld [vmem:[%s511_s0 + $0x10] sm:$0xff] }
   0xb   :  { %v21_v15 = vld [vmem:[%s511_s0 + $0x48] sm:$0xff]  ;;  %v22_v17 = vld [vmem:[%s511_s0 + $0x50] sm:$0xff]  ;;  %v15_v18 = vld [vmem:[%s511_s0 + $0x18] sm:$0xff] }
   0xc   :  { %v23_v19 = vld [vmem:[%s511_s0 + $0x58] sm:$0xff]  ;;  %v16_v20 = vld [vmem:[%s511_s0 + $0x20] sm:$0xff]  ;;  %v17_v22 = vld [vmem:[%s511_s0 + $0x28] sm:$0xff] }
   0xd   :  { %353 = vmatpush3.bf16.msra.mxu0 %v350_v10  ;;  %364 = vmatpush3.bf16.msra.mxu1 %v350_v10  ;;  %v24_v21 = vld [vmem:[%s511_s0 + $0x60] sm:$0xff]  ;;  %v25_v23 = vld [vmem:[%s511_s0 + $0x68] sm:$0xff]  ;;  %v18_v24 = vld [vmem:[%s511_s0 + $0x30] sm:$0xff] }
   0xe   :  { %355 = vmatprep.subr.bf16.mxu0 %v354_v13  ;;  %361 = vmatprep.subr.bf16.mxu1 %v354_v13  ;;  %v26_v25 = vld [vmem:[%s511_s0 + $0x70] sm:$0xff]  ;;  %v19_v26 = vld [vmem:[%s511_s0 + $0x38] sm:$0xff] }
   0xf   :  { %v27_v27 = vld [vmem:[%s511_s0 + $0x78] sm:$0xff]  ;;  %s393_s0 = smov [#allocation2]  }
  0x10   :  { %s251_s28 = sshll.u32 %s393_s0, 4  ;;  %s252_s28 = int_to_ptr.vmem [resolvable:$true] %s251_s28 }
  0x11   :  { %357 = vmatpush3.bf16.msra.mxu0 %v354_v13  ;;  %365 = vmatpush3.bf16.msra.mxu1 %v354_v13  ;;  %s369_s29 = scalar_lea.vmem %s252_s28, 2048  ;;  %p374_p1 = scmp.lt.s32.totalorder %s252_s28, %s252_s28 }
  0x12   :  { %p370_p0 = scmp.ne.s32.totalorder %s252_s28, %s369_s29  ;;  %p375_p2 = scmp.lt.s32.totalorder %s369_s29, %s369_s29 }
  0x14   :  { %319 = vmatmul.mubr.msk.f32.vlgmr.msra.gmra.mrb[0].mxu0 %vm36_vm0, %v13_v14  ;;  %331 = vmatmul.mubr.msk.f32.vlgmr.msra.gmra.mrb[0].mxu1 %vm36_vm0, %v21_v15  ;;  %p376_p3 = por %p375_p2, %p374_p1 }
  0x15   :  { %321 = vmatprep.mubr.msk.f32.mxu0 %vm36_vm0, %v14_v16  ;;  %333 = vmatprep.mubr.msk.f32.mxu1 %vm36_vm0, %v22_v17 }
  0x16   :  { %p377_p4 = pnand %p376_p3, %p370_p0 }
  0x18   :  { %322 = vmatmul.mubr.msk.f32.gmra.mrb[2].mxu0 %vm36_vm0, %v15_v18  ;;  %334 = vmatmul.mubr.msk.f32.gmra.mrb[2].mxu1 %vm36_vm0, %v23_v19 }
  0x19   :  { %324 = vmatprep.mubr.msk.f32.mxu0 %vm36_vm0, %v16_v20  ;;  %336 = vmatprep.mubr.msk.f32.mxu1 %vm36_vm0, %v24_v21 }
  0x1c   :  { %325 = vmatmul.mubr.msk.f32.gmra.mrb[4].mxu0 %vm36_vm0, %v17_v22  ;;  %337 = vmatmul.mubr.msk.f32.gmra.mrb[4].mxu1 %vm36_vm0, %v25_v23 }
  0x1d   :  { %327 = vmatprep.mubr.msk.f32.mxu0 %vm36_vm0, %v18_v24  ;;  %339 = vmatprep.mubr.msk.f32.mxu1 %vm36_vm0, %v26_v25 }
  0x20   :  { %328 = vmatmul.mubr.msk.f32.gmra.mrb[6].mxu0 %vm36_vm0, %v19_v26  ;;  %340 = vmatmul.mubr.msk.f32.gmra.mrb[6].mxu1 %vm36_vm0, %v27_v27 }
  0xe7   :  { %v320_v28 = vpop.f32.mrb[0].mxu0  ;;  %v332_v29 = vpop.f32.mrb[0].mxu1 }
  0xe8   :  { %231 = vst [vmem:[#allocation2 + $0x8] sm:$0xff] %v320_v28  ;;  %239 = vst [vmem:[#allocation2 + $0x48] sm:$0xff] %v332_v29  ;;  %v151_v30 = vpop.f32.mrb[1].mxu0  ;;  %v191_v31 = vpop.f32.mrb[1].mxu1 }
  0xe9   :  { %230 = vst [vmem:[#allocation2] sm:$0xff] %v151_v30  ;;  %238 = vst [vmem:[#allocation2 + $0x40] sm:$0xff] %v191_v31 }
  0xeb   :  { %v323_v32 = vpop.f32.mrb[2].mxu0  ;;  %v335_v33 = vpop.f32.mrb[2].mxu1 }
  0xec   :  { %233 = vst [vmem:[#allocation2 + $0x18] sm:$0xff] %v323_v32  ;;  %241 = vst [vmem:[#allocation2 + $0x58] sm:$0xff] %v335_v33  ;;  %v161_v34 = vpop.f32.mrb[3].mxu0  ;;  %v201_v35 = vpop.f32.mrb[3].mxu1 }
  0xed   :  { %232 = vst [vmem:[#allocation2 + $0x10] sm:$0xff] %v161_v34  ;;  %240 = vst [vmem:[#allocation2 + $0x50] sm:$0xff] %v201_v35 }
  0xef   :  { %v326_v36 = vpop.f32.mrb[4].mxu0  ;;  %v338_v37 = vpop.f32.mrb[4].mxu1 }
  0xf0   :  { %235 = vst [vmem:[#allocation2 + $0x28] sm:$0xff] %v326_v36  ;;  %243 = vst [vmem:[#allocation2 + $0x68] sm:$0xff] %v338_v37  ;;  %v171_v38 = vpop.f32.mrb[5].mxu0  ;;  %v211_v39 = vpop.f32.mrb[5].mxu1 }
  0xf1   :  { %234 = vst [vmem:[#allocation2 + $0x20] sm:$0xff] %v171_v38  ;;  %242 = vst [vmem:[#allocation2 + $0x60] sm:$0xff] %v211_v39 }
  0xf3   :  { %v329_v40 = vpop.f32.mrb[6].mxu0  ;;  %v341_v41 = vpop.f32.mrb[6].mxu1 }
  0xf4   :  { %237 = vst [vmem:[#allocation2 + $0x38] sm:$0xff] %v329_v40  ;;  %245 = vst [vmem:[#allocation2 + $0x78] sm:$0xff] %v341_v41  ;;  %v181_v42 = vpop.f32.mrb[7].mxu0  ;;  %v221_v43 = vpop.f32.mrb[7].mxu1 }
  0xf5   :  { %236 = vst [vmem:[#allocation2 + $0x30] sm:$0xff] %v181_v42  ;;  %244 = vst [vmem:[#allocation2 + $0x70] sm:$0xff] %v221_v43 }
  0xf6   :  { %380 = shalt.err (!%p377_p4)
}
  0xf7   :  { %s381_s3 = scalar_lea.hbm %s513_s2, 2048 }
  0xf8   :  { %p382_p5 = scmp.ne.s32.totalorder %s513_s2, %s381_s3  ;;  %p385_p6 = scmp.lt.u32.totalorder %s381_s3, %s513_s2 }
  0xfa   :  { %p387_p7 = pnand %p385_p6, %p382_p5 }
  0xfc   :  { %390 = shalt.err (!%p387_p7)
}
  0xfd   :  { %s394_s8 = smov 128   ;;  %s395_s9 = smov 8  }
  0xfe   :  { %257 = dma.vmem_to_hbm [thread:$0]  %s252_s28, 2048, %s513_s2, [#allocation3], %s394_s8, %s394_s8, %s395_s9  }
  0xff   :  { %391 = dma.done.wait [#allocation3], 2048  }
 0x100   :  { %392 = vsyncadd [#allocation3], 4294965248 }
 0x101   :  { %261 = vsyncpa [#allocation3], 1 }

</bundles_post_ra>
